<compile_context>
chip_gen: v7x
topology: tpu7x:2x2x1
jax: 0.10.0
libtpu: 0.0.40
codegen_flags: <defaults>
</compile_context>

<pallas_src>
import jax
import jax.numpy as jnp
from jax.experimental import pallas as pl
from jax.experimental.pallas import tpu as pltpu


def make_pinn_kernel(n_mats):
    """Kernel factory: n_mats = number of weight matrices in the MLP."""

    def kernel(bounds_ref, xt_ref, *rest):
        # rest = (w0, b0, w1, b1, ..., w_{L-1}, b_{L-1}, out_ref)
        out_ref = rest[-1]

        Xt = xt_ref[...]                      # (3, TILE) f32; lanes = points
        x1 = Xt[0:1, :]                       # (1, TILE) lane-dense rows
        x2 = Xt[1:2, :]
        t = Xt[2:3, :]

        # MLP in transposed layout: h = W^T @ h + b^T (tanh hidden, linear
        # last). Coordinate shift is already folded into layer 0 by wrapper.
        h = Xt
        for l in range(n_mats):
            w_ref = rest[2 * l]
            b_ref = rest[2 * l + 1]
            z = (jnp.dot(w_ref[...], h, preferred_element_type=jnp.float32)
                 + b_ref[...])
            h = jnp.tanh(z) if l < n_mats - 1 else z
        n_out = h                             # (1, TILE)

        lb0 = bounds_ref[0]
        ub0 = bounds_ref[1]
        lb1 = bounds_ref[2]
        ub1 = bounds_ref[3]

        # Distance-like multiplier enforcing the Dirichlet lift.
        g = (x1 - lb0) * (x1 - ub0) * (x2 - lb1) * (x2 - ub1)   # (1, TILE)

        # TODO(synk): g0 is a user-supplied analytic lift in the original
        # model; a fixed deterministic choice is implemented here.
        g0 = jnp.sin(jnp.pi * x1) * jnp.sin(jnp.pi * x2) * jnp.exp(-t)

        out_ref[...] = g * n_out + g0

    return kernel


def pinn_forward(x1, x2, t, lb, ub, weights, biases, *, tile=512):
    """Pallas wrapper. x1, x2, t: (N,1) f32; lb, ub: (3,) f32."""
    x1 = x1.astype(jnp.float32)
    x2 = x2.astype(jnp.float32)
    t = t.astype(jnp.float32)
    lb = jnp.asarray(lb, jnp.float32).reshape(3)
    ub = jnp.asarray(ub, jnp.float32).reshape(3)
    weights = [w.astype(jnp.float32) for w in weights]
    biases = [b.astype(jnp.float32) for b in biases]

    # Fold Xs = 2*(X - lb)/(ub - lb) - 1 into layer 0:
    #   Xs @ W0 + b0 = X @ (diag(s) W0) + (c @ W0 + b0),  s=2/(ub-lb), c=-s*lb-1
    s = 2.0 / (ub - lb)
    c = -2.0 * lb / (ub - lb) - 1.0
    w0f = weights[0] * s[:, None]
    b0f = biases[0] + c[None, :] @ weights[0]
    wts = [w0f] + weights[1:]
    bs = [b0f] + biases[1:]

    # Transposed (points-on-lanes) layout: W^T (out, in), b^T (out, 1).
    wts_t = [w.T for w in wts]
    bs_t = [b.T for b in bs]

    N = x1.shape[0]
    n_pad = ((N + tile - 1) // tile) * tile
    Xt = jnp.concatenate([x1, x2, t], axis=1).T          # (3, N)
    Xt = jnp.pad(Xt, ((0, 0), (0, n_pad - N)))           # (3, n_pad)

    bounds = jnp.stack([lb[0], ub[0], lb[1], ub[1]])     # (4,) -> SMEM scalars

    grid = (n_pad // tile,)
    args = [bounds, Xt]
    in_specs = [
        pl.BlockSpec(memory_space=pltpu.MemorySpace.SMEM),      # bounds
        pl.BlockSpec((3, tile), lambda i: (0, i)),              # X^T tile
    ]
    for wt, bt in zip(wts_t, bs_t):
        in_specs.append(pl.BlockSpec(wt.shape, lambda i: (0, 0)))  # resident
        in_specs.append(pl.BlockSpec(bt.shape, lambda i: (0, 0)))  # resident
        args.append(wt)
        args.append(bt)

    # Advisory cost hint for XLA's scheduler.
    hidden_units = sum(w.shape[1] for w in weights[:-1])
    flops = 2 * n_pad * sum(w.shape[0] * w.shape[1] for w in weights)
    transcendentals = n_pad * (hidden_units + 3)   # tanh per hidden + sin,sin,exp
    param_bytes = 4 * sum(w.size + b.size for w, b in zip(wts_t, bs_t))
    bytes_accessed = 4 * (Xt.size + n_pad) + param_bytes

    out = pl.pallas_call(
        make_pinn_kernel(len(weights)),
        out_shape=jax.ShapeDtypeStruct((1, n_pad), jnp.float32),
        grid=grid,
        in_specs=in_specs,
        out_specs=pl.BlockSpec((1, tile), lambda i: (0, i)),
        compiler_params=pltpu.CompilerParams(
            dimension_semantics=("parallel",),
            vmem_limit_bytes=32 * 1024 * 1024),
        cost_estimate=pl.CostEstimate(
            flops=flops,
            transcendentals=transcendentals,
            bytes_accessed=bytes_accessed),
    )(*args)

    return out[:, :N].T                                   # (N, 1), as in torch


def xavier_normal(key, fan_in, fan_out):
    std = jnp.sqrt(2.0 / (fan_in + fan_out))
    return std * jax.random.normal(key, (fan_in, fan_out), dtype=jnp.float32)


def init_mlp(key, layers):
    """Mirrors PINN.initialize_NN: xavier-normal weights, zero biases."""
    weights, biases = [], []
    for l in range(len(layers) - 1):
        key, sub = jax.random.split(key)
        weights.append(xavier_normal(sub, layers[l], layers[l + 1]))
        biases.append(jnp.zeros((1, layers[l + 1]), dtype=jnp.float32))
    return weights, biases


def pinn_forward_ref(x1, x2, t, lb, ub, weights, biases):
    """Pure-JAX reference for validation (un-folded, un-transposed)."""
    X = jnp.concatenate([x1, x2, t], axis=1)
    Xs = 2.0 * (X - lb[None, :]) / (ub[None, :] - lb[None, :]) - 1.0
    h = Xs
    for w, b in zip(weights[:-1], biases[:-1]):
        h = jnp.tanh(h @ w + b)
    n_out = h @ weights[-1] + biases[-1]
    g = (x1 - lb[0]) * (x1 - ub[0]) * (x2 - lb[1]) * (x2 - ub[1])
    g0 = jnp.sin(jnp.pi * x1) * jnp.sin(jnp.pi * x2) * jnp.exp(-t)
    return g * n_out + g0


if __name__ == "__main__":
    key = jax.random.PRNGKey(0)

    # Small shapes consistent with the module: N collocation points, 3 inputs.
    N = 1000                       # deliberately not a multiple of the tile
    psi1_layers = [3, 32, 32, 1]

    key, k_w, k_x1, k_x2, k_t = jax.random.split(key, 5)
    weights, biases = init_mlp(k_w, psi1_layers)

    lb = jnp.array([0.0, 0.0, 0.0], dtype=jnp.float32)
    ub = jnp.array([1.0, 1.0, 1.0], dtype=jnp.float32)

    x1 = jax.random.uniform(k_x1, (N, 1), dtype=jnp.float32)
    x2 = jax.random.uniform(k_x2, (N, 1), dtype=jnp.float32)
    t = jax.random.uniform(k_t, (N, 1), dtype=jnp.float32)

    out = pinn_forward(x1, x2, t, lb, ub, weights, biases, tile=512)
    out = jax.block_until_ready(out)

    ref = pinn_forward_ref(x1, x2, t, lb, ub, weights, biases)
    assert out.shape == (N, 1)
    assert jnp.allclose(out, ref, atol=2e-5, rtol=1e-4), (
        float(jnp.max(jnp.abs(out - ref))))

    print("KERNEL_OK")
</pallas_src>

<mosaic_0001>
module attributes {stable_mosaic.version = 11 : i64} {
  func.func @kernel(%arg0: i32, %arg1: memref<4xf32, #tpu.memory_space<smem>>, %arg2: memref<3x512xf32, #tpu.memory_space<vmem>>, %arg3: memref<32x3xf32, #tpu.memory_space<vmem>>, %arg4: memref<32x1xf32, #tpu.memory_space<vmem>>, %arg5: memref<32x32xf32, #tpu.memory_space<vmem>>, %arg6: memref<32x1xf32, #tpu.memory_space<vmem>>, %arg7: memref<1x32xf32, #tpu.memory_space<vmem>>, %arg8: memref<1x1xf32, #tpu.memory_space<vmem>>, %arg9: memref<1x512xf32, #tpu.memory_space<vmem>>) attributes {dimension_semantics = [#tpu.dimension_semantics<parallel>], iteration_bounds = array<i64: 2>, scalar_prefetch = 0 : i64, scratch_operands = 0 : i64, tpu.core_type = #tpu.core_type<tc>, window_params = [{transform_indices = @transform_0, window_bounds = array<i64: 4>}, {transform_indices = @transform_1, window_bounds = array<i64: 3, 512>}, {pipeline_mode = #tpu.pipeline_mode<synchronous>, transform_indices = @transform_2, window_bounds = array<i64: 32, 3>}, {pipeline_mode = #tpu.pipeline_mode<synchronous>, transform_indices = @transform_3, window_bounds = array<i64: 32, 1>}, {pipeline_mode = #tpu.pipeline_mode<synchronous>, transform_indices = @transform_4, window_bounds = array<i64: 32, 32>}, {pipeline_mode = #tpu.pipeline_mode<synchronous>, transform_indices = @transform_5, window_bounds = array<i64: 32, 1>}, {pipeline_mode = #tpu.pipeline_mode<synchronous>, transform_indices = @transform_6, window_bounds = array<i64: 1, 32>}, {pipeline_mode = #tpu.pipeline_mode<synchronous>, transform_indices = @transform_7, window_bounds = array<i64: 1, 1>}, {transform_indices = @transform_8, window_bounds = array<i64: 1, 512>}]} {
    %c0 = arith.constant 0 : index
    %c0_0 = arith.constant 0 : index
    %0 = vector.load %arg2[%c0, %c0_0] : memref<3x512xf32, #tpu.memory_space<vmem>>, vector<3x512xf32>
    %1 = vector.extract_strided_slice %0 {offsets = [0, 0], sizes = [1, 512], strides = [1, 1]} : vector<3x512xf32> to vector<1x512xf32>
    %2 = vector.extract_strided_slice %0 {offsets = [1, 0], sizes = [1, 512], strides = [1, 1]} : vector<3x512xf32> to vector<1x512xf32>
    %3 = vector.extract_strided_slice %0 {offsets = [2, 0], sizes = [1, 512], strides = [1, 1]} : vector<3x512xf32> to vector<1x512xf32>
    %c0_1 = arith.constant 0 : index
    %c0_2 = arith.constant 0 : index
    %4 = vector.load %arg3[%c0_1, %c0_2] : memref<32x3xf32, #tpu.memory_space<vmem>>, vector<32x3xf32>
    %cst = arith.constant dense<0.000000e+00> : vector<32x512xf32>
    %5 = tpu.matmul %4, %0, %cst {dimension_numbers = #tpu.dot_dimension_numbers<[1], [0], [0], [1], [0, 0, 1, 1], [], []>} : vector<32x3xf32>, vector<3x512xf32>, vector<32x512xf32> -> vector<32x512xf32>
    %c0_3 = arith.constant 0 : index
    %c0_4 = arith.constant 0 : index
    %6 = vector.load %arg4[%c0_3, %c0_4] : memref<32x1xf32, #tpu.memory_space<vmem>>, vector<32x1xf32>
    %7 = vector.broadcast %6 : vector<32x1xf32> to vector<32x512xf32>
    %8 = arith.addf %5, %7 : vector<32x512xf32>
    %9 = math.tanh %8 : vector<32x512xf32>
    %c0_5 = arith.constant 0 : index
    %c0_6 = arith.constant 0 : index
    %10 = vector.load %arg5[%c0_5, %c0_6] : memref<32x32xf32, #tpu.memory_space<vmem>>, vector<32x32xf32>
    %cst_7 = arith.constant dense<0.000000e+00> : vector<32x512xf32>
    %11 = tpu.matmul %10, %9, %cst_7 {dimension_numbers = #tpu.dot_dimension_numbers<[1], [0], [0], [1], [0, 0, 1, 1], [], []>} : vector<32x32xf32>, vector<32x512xf32>, vector<32x512xf32> -> vector<32x512xf32>
    %c0_8 = arith.constant 0 : index
    %c0_9 = arith.constant 0 : index
    %12 = vector.load %arg6[%c0_8, %c0_9] : memref<32x1xf32, #tpu.memory_space<vmem>>, vector<32x1xf32>
    %13 = vector.broadcast %12 : vector<32x1xf32> to vector<32x512xf32>
    %14 = arith.addf %11, %13 : vector<32x512xf32>
    %15 = math.tanh %14 : vector<32x512xf32>
    %c0_10 = arith.constant 0 : index
    %c0_11 = arith.constant 0 : index
    %16 = vector.load %arg7[%c0_10, %c0_11] : memref<1x32xf32, #tpu.memory_space<vmem>>, vector<1x32xf32>
    %cst_12 = arith.constant dense<0.000000e+00> : vector<1x512xf32>
    %17 = tpu.matmul %16, %15, %cst_12 {dimension_numbers = #tpu.dot_dimension_numbers<[1], [0], [0], [1], [0, 0, 1, 1], [], []>} : vector<1x32xf32>, vector<32x512xf32>, vector<1x512xf32> -> vector<1x512xf32>
    %c0_13 = arith.constant 0 : index
    %c0_14 = arith.constant 0 : index
    %18 = vector.load %arg8[%c0_13, %c0_14] : memref<1x1xf32, #tpu.memory_space<vmem>>, vector<1x1xf32>
    %19 = vector.broadcast %18 : vector<1x1xf32> to vector<1x512xf32>
    %20 = arith.addf %17, %19 : vector<1x512xf32>
    %c0_15 = arith.constant 0 : index
    %21 = memref.load %arg1[%c0_15] : memref<4xf32, #tpu.memory_space<smem>>
    %c1 = arith.constant 1 : index
    %22 = memref.load %arg1[%c1] : memref<4xf32, #tpu.memory_space<smem>>
    %c2 = arith.constant 2 : index
    %23 = memref.load %arg1[%c2] : memref<4xf32, #tpu.memory_space<smem>>
    %c3 = arith.constant 3 : index
    %24 = memref.load %arg1[%c3] : memref<4xf32, #tpu.memory_space<smem>>
    %25 = vector.broadcast %21 : f32 to vector<1x512xf32>
    %26 = arith.subf %1, %25 : vector<1x512xf32>
    %27 = vector.broadcast %22 : f32 to vector<1x512xf32>
    %28 = arith.subf %1, %27 : vector<1x512xf32>
    %29 = arith.mulf %26, %28 : vector<1x512xf32>
    %30 = vector.broadcast %23 : f32 to vector<1x512xf32>
    %31 = arith.subf %2, %30 : vector<1x512xf32>
    %32 = arith.mulf %29, %31 : vector<1x512xf32>
    %33 = vector.broadcast %24 : f32 to vector<1x512xf32>
    %34 = arith.subf %2, %33 : vector<1x512xf32>
    %35 = arith.mulf %32, %34 : vector<1x512xf32>
    %cst_16 = arith.constant 3.14159274 : f32
    %36 = vector.broadcast %cst_16 : f32 to vector<1x512xf32>
    %37 = arith.mulf %36, %1 : vector<1x512xf32>
    %38 = math.sin %37 : vector<1x512xf32>
    %cst_17 = arith.constant 3.14159274 : f32
    %39 = vector.broadcast %cst_17 : f32 to vector<1x512xf32>
    %40 = arith.mulf %39, %2 : vector<1x512xf32>
    %41 = math.sin %40 : vector<1x512xf32>
    %42 = arith.mulf %38, %41 : vector<1x512xf32>
    %cst_18 = arith.constant 0.000000e+00 : f32
    %43 = vector.broadcast %cst_18 : f32 to vector<1x512xf32>
    %44 = arith.subf %43, %3 : vector<1x512xf32>
    %45 = math.exp %44 : vector<1x512xf32>
    %46 = arith.mulf %42, %45 : vector<1x512xf32>
    %47 = arith.mulf %35, %20 : vector<1x512xf32>
    %48 = arith.addf %47, %46 : vector<1x512xf32>
    %c0_19 = arith.constant 0 : index
    %c0_20 = arith.constant 0 : index
    %49 = vector.load %arg9[%c0_19, %c0_20] : memref<1x512xf32, #tpu.memory_space<vmem>>, vector<1x512xf32>
    tpu.vector_store %arg9[%c0_19, %c0_20], %48 {strides = array<i32>} : memref<1x512xf32, #tpu.memory_space<vmem>>, vector<1x512xf32>,
    return
  }
  func.func @transform_0(%arg0: i32) -> i32 {
    %c0_i32 = arith.constant 0 : i32
    %c0_i32_0 = arith.constant 0 : i32
    return %c0_i32 : i32
  }
  func.func @transform_1(%arg0: i32) -> (i32, i32) {
    %c0_i32 = arith.constant 0 : i32
    %c0_i32_0 = arith.constant 0 : i32
    return %c0_i32, %arg0 : i32, i32
  }
  func.func @transform_2(%arg0: i32) -> (i32, i32) {
    %c0_i32 = arith.constant 0 : i32
    %c0_i32_0 = arith.constant 0 : i32
    %c0_i32_1 = arith.constant 0 : i32
    return %c0_i32, %c0_i32_0 : i32, i32
  }
  func.func @transform_3(%arg0: i32) -> (i32, i32) {
    %c0_i32 = arith.constant 0 : i32
    %c0_i32_0 = arith.constant 0 : i32
    %c0_i32_1 = arith.constant 0 : i32
    return %c0_i32, %c0_i32_0 : i32, i32
  }
  func.func @transform_4(%arg0: i32) -> (i32, i32) {
    %c0_i32 = arith.constant 0 : i32
    %c0_i32_0 = arith.constant 0 : i32
    %c0_i32_1 = arith.constant 0 : i32
    return %c0_i32, %c0_i32_0 : i32, i32
  }
  func.func @transform_5(%arg0: i32) -> (i32, i32) {
    %c0_i32 = arith.constant 0 : i32
    %c0_i32_0 = arith.constant 0 : i32
    %c0_i32_1 = arith.constant 0 : i32
    return %c0_i32, %c0_i32_0 : i32, i32
  }
  func.func @transform_6(%arg0: i32) -> (i32, i32) {
    %c0_i32 = arith.constant 0 : i32
    %c0_i32_0 = arith.constant 0 : i32
    %c0_i32_1 = arith.constant 0 : i32
    return %c0_i32, %c0_i32_0 : i32, i32
  }
  func.func @transform_7(%arg0: i32) -> (i32, i32) {
    %c0_i32 = arith.constant 0 : i32
    %c0_i32_0 = arith.constant 0 : i32
    %c0_i32_1 = arith.constant 0 : i32
    return %c0_i32, %c0_i32_0 : i32, i32
  }
  func.func @transform_8(%arg0: i32) -> (i32, i32) {
    %c0_i32 = arith.constant 0 : i32
    %c0_i32_0 = arith.constant 0 : i32
    return %c0_i32, %arg0 : i32, i32
  }
}

</mosaic_0001>

<bundles_post_ra>
// kernel: tpu_custom_call.1
= control target key start
LH: loop header
LB: loop body
LE: loop exit
PB: predicated region body
PF: predicated region fallthrough
CT: control target
= control target key end

     0   :  { %s2121_s0 = inlined_call_operand.vmem [shape: f32[4], index: 0, kind: input, shape index: {}]   ;;  %s2122_s1 = inlined_call_operand.vmem [shape: f32[3,1024], index: 1, kind: input, shape index: {}]   ;;  %s2123_s2 = inlined_call_operand.vmem [shape: f32[32,3], index: 2, kind: input, shape index: {}]   ;;  %s2124_s3 = inlined_call_operand.vmem [shape: f32[32,1], index: 3, kind: input, shape index: {}]   ;;  %s2125_s4 = inlined_call_operand.vmem [shape: f32[32,32], index: 4, kind: input, shape index: {}]   ;;  %s2126_s5 = inlined_call_operand.vmem [shape: f32[32,1], index: 5, kind: input, shape index: {}]   ;;  %s2127_s6 = inlined_call_operand.vmem [shape: f32[1,32], index: 6, kind: input, shape index: {}]   ;;  %s2128_s7 = inlined_call_operand.<no memory space> [shape: f32[1,1], index: 7, kind: input, shape index: {}]   ;;  %s2129_s8 = inlined_call_operand.hbm [shape: f32[1,1024], index: 8, kind: output, shape index: {}]  }
   0x1   :  { %v13_v0 = vstv %s2128_s7 }
   0x2   :  { %14 = vst [vmem:[#allocation2] sm:$0x1] %v13_v0 }
   0x3   :  { %15 = vsyncpa [#allocation5], 0 }
   0x4   :  { %16 = vsyncpa [#allocation4], 0 }
   0x5   :  { %18 = vsyncpa [#allocation4 + $0x1], 0  ;;  %s1743_s29 = smov 0   ;;  %s1745_s30 = smov 0  }
   0x6   :  { %s1747_s9 = smov 0   ;;  %s1749_s10 = smov 0  }
   0x7 LB: > { %s1764_s7 = sadd.s32 4294967295, %s1682_s10   ;;  %s1366_s11 = sadd.s32 4294967294, %s1682_s10   ;;  %s1682_s10 = sphi %s1749_s10, %s2140_s10   ;;  %s1678_s9 = sphi %s1747_s9, %s2139_s9   ;;  %s1674_s30 = sphi %s1745_s30, %s2138_s30   ;;  %s1670_s29 = sphi %s1743_s29, %s2137_s29  }
   0x8   : > { %s1768_s12 = sadd.s32 1, %s1682_s10   ;;  %s204_s13 = sadd.s32 1, %s1678_s9 }
   0x9   : > { %s201_s14 = ssub.s32 %s1682_s10, %s1768_s12  ;;  %p214_p0 = scmp.ne.s32.totalorder %s1678_s9, %s1674_s30 }
   0xa   : > { %p202_p1 = scmp.eq.s32.totalorder %s201_s14, 0  ;;  %p215_p2 = scmp.eq.s32.totalorder %s1764_s7, 1 }
   0xb   : > { %p220_p3 = scmp.ne.s32.totalorder %s1674_s30, %s1670_s29  ;;  %p221_p4 = scmp.eq.s32.totalorder %s1366_s11, 1 }
   0xc   : > { %s1779_s15 = scalar_select %p202_p1, %s1678_s9, %s204_s13  }
   0xd   : > { %p1781_p5 = por %p215_p2, %p214_p0  ;;  %p1785_p6 = por %p221_p4, %p220_p3 }
   0xe   : > { %p1367_p7 = scmp.ge.s32.totalorder %s1682_s10, 1  ;;  %p228_p8 = scmp.lt.s32.totalorder %s1682_s10, 3 }
   0xf   : > { %p1476_p9 = scmp.eq.s32.totalorder %s1764_s7, 0  ;;  %s241_s21 = sshll.u32 %s2121_s0, 4  ;;  %s242_s21 = int_to_ptr.vmem [resolvable:$true] %s241_s21 }
  0x10   : > { %p1792_p10 = pnand %p1367_p7, %p228_p8  ;;  %s1601_s22 = scalar_lea.vmem %s242_s21, 16 }
  0x11   : > { %p1602_p13 = scmp.ne.s32.totalorder %s242_s21, %s1601_s22  ;;  %p1609_p3 = scmp.lt.s32.totalorder %s242_s21, %s242_s21 }
  0x12   : > { %p1468_p11 = pneg %p1792_p10  ;;  %p1610_p4 = scmp.lt.s32.totalorder %s1601_s22, %s1601_s22 }
  0x14   : > { %p1469_p12 = pnand %p1476_p9, %p1468_p11  ;;  %p1611_p7 = por %p1610_p4, %p1609_p3 }
  0x16   : > { %p1603_p0 = pneg %p1469_p12 }
  0x18   : > { %p1604_p1 = pnand %p1603_p0, %p1602_p13 }
  0x1a   : > { %p1605_p2 = pneg %p1604_p1 }
  0x1c   : > { %p1612_p8 = pnand %p1611_p7, %p1605_p2 }
  0x1e   : > { %1615 = shalt.err (!%p1612_p8)
}
  0x1f   : > { %s1684_s23 = smov [#allocation3]   ;;  %281 = sbr.rel (%p1792_p10) target bundleno = 784 (0x310), region = 52 }
  0x20   : > { %1471 = dma.vmem_to_smem (!%p1469_p12), %s242_s21, 16, %s1684_s23, [#allocation5]  }
  0x26   : > { %1661 = dma.done.wait (%p1476_p9), [#allocation5], 16  }
  0x27   : > { %1663 = vsyncadd (%p1476_p9), [#allocation5], 4294967280 }
  0x28   : > { %287 = sfence }
  0x29   : > { %s1373_s24 = sshll.u32 %s1764_s7, 2  ;;  %v1685_v1 = vmov 0.0   ;;  %v329_v2 = vld [vmem:[%s2124_s3] sm:$0xff]  ;;  %v1686_v3 = vmov 0   ;;  %v331_v4 = vld [vmem:[%s2124_s3 + $0x10] sm:$0xff]  ;;  %v330_v5 = vld [vmem:[%s2124_s3 + $0x8] sm:$0xff] }
  0x2a   : > { %p317_p11 = scmp.lt.s32.totalorder %s1373_s24, 7  ;;  %443 = vmatprep.mubr.f32.mxu0 %v1685_v1  ;;  %532 = vmatprep.mubr.f32.mxu1 %v1685_v1  ;;  %v332_v6 = vld [vmem:[%s2124_s3 + $0x18] sm:$0xff]  ;;  %vm370_vm0 = vcmask 1042432   ;;  %v325_v11 = vld [vmem:[%s2123_s2] sm:$0xff]  ;;  %vm357_vm1 = vcmask 23552   ;;  %v578_v13 = vld [vmem:[%s2126_s5 + $0x8] sm:$0xff] }
  0x2b   : > { %1521 = vset.pattern.permute.xlu0 %v1686_v3  ;;  %1522 = vset.pattern.permute.xlu1 %v1686_v3  ;;  %v577_v12 = vld [vmem:[%s2126_s5] sm:$0xff]  ;;  %v326_v14 = vld [vmem:[%s2123_s2 + $0x8] sm:$0xff]  ;;  %v579_v15 = vld [vmem:[%s2126_s5 + $0x10] sm:$0xff]  ;;  %vm601_vm2 = vcmask 261120   ;;  %s2048_s21 = sld [smem:[#allocation3]]  ;;  %s2052_s23 = sld [smem:[#allocation3 + $0x2]] }
  0x2c   : > { %s2142_s24 = smov (!%p317_p11, %s1373_s24), 7  ;;  %335 = vperm.xlu0 %1521, %v329_v2   ;;  %345 = vperm.xlu1 %1522, %v331_v4   ;;  %v580_v16 = vld [vmem:[%s2126_s5 + $0x18] sm:$0xff]  ;;  %v327_v17 = vld [vmem:[%s2123_s2 + $0x10] sm:$0xff]  ;;  %v809_v18 = vld [vmem:[#allocation2] sm:$0x1]  ;;  %s2056_s25 = sld [smem:[#allocation3 + $0x3]] }
  0x2d   : > { %s1374_s19 = sshll.u32 %s2142_s24, 2  ;;  %v328_v19 = vld [vmem:[%s2123_s2 + $0x18] sm:$0xff]  ;;  %s313_s24 = sand.u32 1, %s1674_s30  }
  0x2e   : > { %s320_s22 = scalar_lea.vmem %s2122_s1, %s1374_s19  ;;  %s1372_s26 = sshll.u32 %s313_s24, 2 }
  0x2f   : > { %v1827_v7 = vld [vmem:[%s320_s22] sm:$0x77]  ;;  %v1829_v8 = vld [vmem:[%s320_s22 + $0x8] sm:$0x77]  ;;  %s2050_s22 = sld [smem:[#allocation3 + $0x1]]  ;;  %s1421_s27 = sshll.u32 %s1764_s7, 6 }
  0x30   : > { %340 = vperm.xlu0 %1521, %v330_v5   ;;  %350 = vperm.xlu1 %1522, %v332_v6   ;;  %v355_v9 = vcombine.high %v1827_v7, %v1827_v7  ;;  %v356_v10 = vcombine.high %v1829_v8, %v1829_v8  ;;  %s315_s28 = scalar_lea.vmem [#allocation6], %s1372_s26  ;;  %s2079_s18 = scalar_lea.hbm %s2129_s8, %s1421_s27 }
  0x31   : > { %s1295_s11 = sshll.u32 %s315_s28, 4  ;;  %s1281_s19 = scalar_lea.sflag [#allocation4], %s313_s24  ;;  %s2081_s11 = int_to_ptr.vmem [resolvable:$true] %s1295_s11 }
  0x32   : > { %1375 = vmatprep.subr.msk.mxu0 %vm370_vm0, %v355_v9  ;;  %1381 = vmatprep.subr.msk.mxu1 %vm370_vm0, %v356_v10  ;;  %s1616_s20 = scalar_lea.vmem %s2081_s11, 64  ;;  %s1694_s7 = smov [#allocation6]  }
  0x33   : > { %1376 = vmatpush1.msk.msra.mxu0 %vm370_vm0, %v1827_v7  ;;  %1382 = vmatpush1.msk.msra.mxu1 %vm370_vm0, %v1829_v8  ;;  %p1617_p9 = scmp.ne.s32.totalorder %s2081_s11, %s1616_s20 }
  0x34   : > { %1377 = vmatmul.mubr.msk.f32.vlgmr.msra.gmra.mrb[0].mxu0 %vm357_vm1, %v325_v11  ;;  %1383 = vmatmul.mubr.msk.f32.vlgmr.msra.gmra.mrb[0].mxu1 %vm357_vm1, %v325_v11 }
  0x35   : > { %449 = vmatprep.mubr.f32.mxu0 %v1685_v1  ;;  %538 = vmatprep.mubr.f32.mxu1 %v1685_v1  ;;  %p1618_p10 = pnand %p1617_p9, %p1781_p5 }
  0x36   : > { %583 = vperm.xlu0 %1521, %v577_v12   ;;  %588 = vperm.xlu1 %1522, %v578_v13  }
  0x37   : > { %p1619_p12 = pneg %p1618_p10 }
  0x38   : > { %1378 = vmatmul.mubr.msk.f32.gmra.mrb[2].mxu0 %vm357_vm1, %v326_v14  ;;  %1384 = vmatmul.mubr.msk.f32.gmra.mrb[2].mxu1 %vm357_vm1, %v326_v14 }
  0x39   : > { %455 = vmatprep.mubr.f32.mxu0 %v1685_v1  ;;  %544 = vmatprep.mubr.f32.mxu1 %v1685_v1 }
  0x3a   : > { %593 = vperm.xlu0 %1521, %v579_v15   ;;  %598 = vperm.xlu1 %1522, %v580_v16  }
  0x3c   : > { %1379 = vmatmul.mubr.msk.f32.gmra.mrb[4].mxu0 %vm357_vm1, %v327_v17  ;;  %1385 = vmatmul.mubr.msk.f32.gmra.mrb[4].mxu1 %vm357_vm1, %v327_v17 }
  0x3d   : > { %461 = vmatprep.mubr.f32.mxu0 %v1685_v1  ;;  %550 = vmatprep.mubr.f32.mxu1 %v1685_v1 }
  0x3e   : > { %812 = vperm.xlu0 %1521, %v809_v18  }
  0x40   : > { %1380 = vmatmul.mubr.msk.f32.gmra.mrb[6].mxu0 %vm357_vm1, %v328_v19  ;;  %1386 = vmatmul.mubr.msk.f32.gmra.mrb[6].mxu1 %vm357_vm1, %v328_v19  ;;  %v573_v19 = vld [vmem:[%s2125_s4] sm:$0xff] }
  0x41   : > { %678 = vmatprep.mubr.f32.mxu0 %v1685_v1  ;;  %767 = vmatprep.mubr.f32.mxu1 %v1685_v1 }
  0xab   : > { %v336_v20 = vpop.permute.xlu0 %335  ;;  %v346_v30 = vpop.permute.xlu1 %345 }
  0xaf   : > { %v341_v29 = vpop.permute.xlu0 %340  ;;  %v351_v47 = vpop.permute.xlu1 %350 }
 0x107   : > { %v445_v21 = vpop.f32.mrb[0].mxu0  ;;  %v534_v22 = vpop.f32.mrb[0].mxu1 }
 0x108   : > { %v446_v23 = vadd.f32 %v445_v21, %v336_v20  ;;  %v535_v24 = vadd.f32 %v534_v22, %v336_v20  ;;  %v447_v25 = vpop.f32.mrb[1].mxu0  ;;  %v536_v26 = vpop.f32.mrb[1].mxu1  ;;  %v575_v21 = vld [vmem:[%s2125_s4 + $0x10] sm:$0xff]  ;;  %v576_v22 = vld [vmem:[%s2125_s4 + $0x18] sm:$0xff] }
 0x109   : > { %v448_v27 = vadd.f32 %v447_v25, %v336_v20  ;;  %v537_v28 = vadd.f32 %v536_v26, %v336_v20  ;;  %v574_v20 = vld [vmem:[%s2125_s4 + $0x8] sm:$0xff] }
 0x10a   : > { %1525 = vtanh.f32 %v446_v23  ;;  %v584_v23 = vpop.permute.xlu0 %583 }
 0x10b   : > { %1527 = vtanh.f32 %v535_v24  ;;  %v451_v31 = vpop.f32.mrb[2].mxu0  ;;  %v540_v32 = vpop.f32.mrb[2].mxu1 }
 0x10c   : > { %1529 = vtanh.f32 %v448_v27  ;;  %v452_v33 = vadd.f32 %v451_v31, %v341_v29  ;;  %v541_v34 = vadd.f32 %v540_v32, %v341_v29  ;;  %v453_v35 = vpop.f32.mrb[3].mxu0  ;;  %v542_v36 = vpop.f32.mrb[3].mxu1 }
 0x10d   : > { %1531 = vtanh.f32 %v537_v28  ;;  %v454_v37 = vadd.f32 %v453_v35, %v341_v29  ;;  %v543_v38 = vadd.f32 %v542_v36, %v341_v29  ;;  %v589_v32 = vpop.permute.xlu1 %588 }
 0x10e   : > { %1533 = vtanh.f32 %v452_v33 }
 0x10f   : > { %1535 = vtanh.f32 %v541_v34  ;;  %v457_v39 = vpop.f32.mrb[4].mxu0  ;;  %v546_v40 = vpop.f32.mrb[4].mxu1 }
 0x110   : > { %1537 = vtanh.f32 %v454_v37  ;;  %v458_v41 = vadd.f32 %v457_v39, %v346_v30  ;;  %v547_v42 = vadd.f32 %v546_v40, %v346_v30  ;;  %v459_v43 = vpop.f32.mrb[5].mxu0  ;;  %v548_v44 = vpop.f32.mrb[5].mxu1 }
 0x111   : > { %1539 = vtanh.f32 %v543_v38  ;;  %v460_v45 = vadd.f32 %v459_v43, %v346_v30  ;;  %v549_v46 = vadd.f32 %v548_v44, %v346_v30  ;;  %v594_v40 = vpop.permute.xlu0 %593 }
 0x112   : > { %1541 = vtanh.f32 %v458_v41 }
 0x113   : > { %1543 = vtanh.f32 %v547_v42  ;;  %v463_v48 = vpop.f32.mrb[6].mxu0  ;;  %v552_v49 = vpop.f32.mrb[6].mxu1 }
 0x114   : > { %v1526_v50 = vpop.eup %1525  ;;  %1545 = vtanh.f32 %v460_v45  ;;  %v464_v51 = vadd.f32 %v463_v48, %v351_v47  ;;  %v553_v52 = vadd.f32 %v552_v49, %v351_v47  ;;  %v465_v53 = vpop.f32.mrb[7].mxu0 }
 0x115   : > { %v554_v54 = vpop.f32.mrb[7].mxu1  ;;  %v1528_v55 = vpop.eup %1527  ;;  %1547 = vtanh.f32 %v549_v46  ;;  %v466_v56 = vadd.f32 %v465_v53, %v351_v47 }
 0x116   : > { %v555_v57 = vadd.f32 %v554_v54, %v351_v47  ;;  %v1530_v58 = vpop.eup %1529  ;;  %1549 = vtanh.f32 %v464_v51  ;;  %v599_v49 = vpop.permute.xlu1 %598 }
 0x117   : > { %v1532_v59 = vpop.eup %1531  ;;  %1551 = vtanh.f32 %v553_v52 }
 0x118   : > { %v1534_v60 = vpop.eup %1533  ;;  %1553 = vtanh.f32 %v466_v56 }
 0x119   : > { %v1536_v61 = vpop.eup %1535  ;;  %1555 = vtanh.f32 %v555_v57  ;;  %v1424_v62 = vpack.c.bf16 %v1534_v60, %v1526_v50 }
 0x11a   : > { %v1538_v63 = vpop.eup %1537  ;;  %v1432_v0 = vpack.c.bf16 %v1536_v61, %v1528_v55 }
 0x11b   : > { %v1540_v2 = vpop.eup %1539  ;;  %v1422_v3 = vpack.c.bf16 %v1538_v63, %v1530_v58 }
 0x11c   : > { %v1542_v4 = vpop.eup %1541  ;;  %v1430_v5 = vpack.c.bf16 %v1540_v2, %v1532_v59 }
 0x11d   : > { %v1544_v6 = vpop.eup %1543  ;;  %1423 = vmatprep.subr.bf16.mxu0 %v1422_v3 }
 0x11e   : > { %v1546_v9 = vpop.eup %1545  ;;  %1431 = vmatprep.subr.bf16.mxu1 %v1430_v5  ;;  %1425 = vmatpush1.bf16.msra.mxu0 %v1424_v62 }
 0x11f   : > { %v1548_v10 = vpop.eup %1547  ;;  %1433 = vmatpush1.bf16.msra.mxu1 %v1432_v0 }
 0x120   : > { %v1550_v11 = vpop.eup %1549 }
 0x121   : > { %v1552_v12 = vpop.eup %1551  ;;  %v1428_v13 = vpack.c.bf16 %v1550_v11, %v1542_v4 }
 0x122   : > { %v1554_v14 = vpop.eup %1553  ;;  %v1436_v15 = vpack.c.bf16 %v1552_v12, %v1544_v6 }
 0x123   : > { %v1556_v16 = vpop.eup %1555  ;;  %v1426_v17 = vpack.c.bf16 %v1554_v14, %v1546_v9 }
 0x124   : > { %v1434_v18 = vpack.c.bf16 %v1556_v16, %v1548_v10 }
 0x125   : > { %1427 = vmatprep.subr.bf16.mxu0 %v1426_v17 }
 0x126   : > { %1435 = vmatprep.subr.bf16.mxu1 %v1434_v18  ;;  %1429 = vmatpush1.bf16.msra.mxu0 %v1428_v13 }
 0x127   : > { %1437 = vmatpush1.bf16.msra.mxu1 %v1436_v15 }
 0x129   : > { %1387 = vmatmul.mubr.msk.f32.vlgmr.msra.gmra.mrb[8].mxu0 %vm601_vm2, %v573_v19 }
 0x12a   : > { %1391 = vmatmul.mubr.msk.f32.vlgmr.msra.gmra.mrb[8].mxu1 %vm601_vm2, %v573_v19  ;;  %684 = vmatprep.mubr.f32.mxu0 %v1685_v1 }
 0x12b   : > { %773 = vmatprep.mubr.f32.mxu1 %v1685_v1 }
 0x12d   : > { %1388 = vmatmul.mubr.msk.f32.gmra.mrb[10].mxu0 %vm601_vm2, %v574_v20 }
 0x12e   : > { %1392 = vmatmul.mubr.msk.f32.gmra.mrb[10].mxu1 %vm601_vm2, %v574_v20  ;;  %690 = vmatprep.mubr.f32.mxu0 %v1685_v1 }
 0x12f   : > { %779 = vmatprep.mubr.f32.mxu1 %v1685_v1 }
 0x131   : > { %1389 = vmatmul.mubr.msk.f32.gmra.mrb[12].mxu0 %vm601_vm2, %v575_v21 }
 0x132   : > { %1393 = vmatmul.mubr.msk.f32.gmra.mrb[12].mxu1 %vm601_vm2, %v575_v21  ;;  %696 = vmatprep.mubr.f32.mxu0 %v1685_v1  ;;  %v808_v21 = vld [vmem:[%s2127_s6] sm:$0x1] }
 0x133   : > { %785 = vmatprep.mubr.f32.mxu1 %v1685_v1 }
 0x135   : > { %1390 = vmatmul.mubr.msk.f32.gmra.mrb[14].mxu0 %vm601_vm2, %v576_v22 }
 0x136   : > { %1394 = vmatmul.mubr.msk.f32.gmra.mrb[14].mxu1 %vm601_vm2, %v576_v22  ;;  %886 = vmatprep.mubr.f32.mxu0 %v1685_v1  ;;  %v1911_v22 = vmul.f32 3.1415927, %v1827_v7 }
 0x137   : > { %957 = vmatprep.mubr.f32.mxu1 %v1685_v1 }
 0x138   : > { %vm1006_vm1 = vcmp.lt.s32.totalorder %v1911_v22, 0 }
 0x1fc   : > { %v680_v24 = vpop.f32.mrb[8].mxu0 }
 0x1fd   : > { %v681_v25 = vadd.f32 %v680_v24, %v584_v23  ;;  %v769_v26 = vpop.f32.mrb[8].mxu1  ;;  %v682_v27 = vpop.f32.mrb[9].mxu0  ;;  %v1007_v24 = vand.u32 2139095040, %v1911_v22 }
 0x1fe   : > { %v770_v28 = vadd.f32 %v769_v26, %v584_v23  ;;  %v683_v29 = vadd.f32 %v682_v27, %v584_v23  ;;  %v771_v30 = vpop.f32.mrb[9].mxu1 }
 0x1ff   : > { %1557 = vtanh.f32 %v681_v25  ;;  %v772_v31 = vadd.f32 %v771_v30, %v584_v23  ;;  %v1914_v23 = vmul.f32 3.1415927, %v1829_v8  ;;  %v1008_v26 = vshrl.u32 %v1007_v24, 23 }
 0x200   : > { %1559 = vtanh.f32 %v770_v28  ;;  %v686_v33 = vpop.f32.mrb[10].mxu0 }
 0x201   : > { %1561 = vtanh.f32 %v683_v29  ;;  %v687_v34 = vadd.f32 %v686_v33, %v589_v32  ;;  %v775_v35 = vpop.f32.mrb[10].mxu1  ;;  %v688_v36 = vpop.f32.mrb[11].mxu0  ;;  %v1111_v25 = vand.u32 2139095040, %v1914_v23  ;;  %v1404_v28 = vadd.s32 4294967169, %v1008_v26 }
 0x202   : > { %1563 = vtanh.f32 %v772_v31  ;;  %v776_v37 = vadd.f32 %v775_v35, %v589_v32  ;;  %v689_v1 = vadd.f32 %v688_v36, %v589_v32  ;;  %v777_v38 = vpop.f32.mrb[11].mxu1 }
 0x203   : > { %1565 = vtanh.f32 %v687_v34  ;;  %v778_v39 = vadd.f32 %v777_v38, %v589_v32  ;;  %v1112_v27 = vshrl.u32 %v1111_v25, 23  ;;  %v1014_v30 = vadd.s32 1, %v1404_v28 }
 0x204   : > { %1567 = vtanh.f32 %v776_v37  ;;  %v692_v41 = vpop.f32.mrb[12].mxu0  ;;  %v1004_v37 = vand.u32 2147483647, %v1911_v22  ;;  %v1687_v38 = vmov 2102212464  }
 0x205   : > { %1569 = vtanh.f32 %v689_v1  ;;  %v693_v42 = vadd.f32 %v692_v41, %v594_v40  ;;  %v781_v43 = vpop.f32.mrb[12].mxu1  ;;  %v694_v44 = vpop.f32.mrb[13].mxu0  ;;  %v1408_v29 = vadd.s32 4294967169, %v1112_v27  ;;  %vm1015_vm3 = vcmp.gt.s32.totalorder %v1014_v30, 0 }
 0x206   : > { %1571 = vtanh.f32 %v778_v39  ;;  %v782_v45 = vadd.f32 %v781_v43, %v594_v40  ;;  %v695_v46 = vadd.f32 %v694_v44, %v594_v40  ;;  %v783_v47 = vpop.f32.mrb[13].mxu1  ;;  %v1016_v32 = vsel %vm1015_vm3, %v1014_v30, 0 }
 0x207   : > { %1573 = vtanh.f32 %v693_v42  ;;  %v784_v48 = vadd.f32 %v783_v47, %v594_v40  ;;  %v1118_v31 = vadd.s32 1, %v1408_v29  ;;  %v1018_v33 = vand.u32 31, %v1016_v32 }
 0x208   : > { %1575 = vtanh.f32 %v782_v45  ;;  %v698_v50 = vpop.f32.mrb[14].mxu0  ;;  %v1688_v40 = vmov 920167782   ;;  %v1011_v42 = vand.u32 8388607, %v1004_v37  ;;  %v1926_v43 = vshrl.u32 %v1016_v32, 5 }
 0x209   : > { %v1558_v51 = vpop.eup %1557  ;;  %1577 = vtanh.f32 %v695_v46  ;;  %v699_v52 = vadd.f32 %v698_v50, %v599_v49  ;;  %v787_v53 = vpop.f32.mrb[14].mxu1  ;;  %vm1119_vm4 = vcmp.gt.s32.totalorder %v1118_v31, 0  ;;  %v1918_v36 = vsub.s32 32, %v1018_v33 }
 0x20a   : > { %v700_v54 = vpop.f32.mrb[15].mxu0  ;;  %v1560_v55 = vpop.eup %1559  ;;  %1579 = vtanh.f32 %v784_v48  ;;  %v788_v56 = vadd.f32 %v787_v53, %v599_v49  ;;  %v1120_v34 = vsel %vm1119_vm4, %v1118_v31, 0  ;;  %v1030_v39 = vshll.u32 %v1687_v38, %v1018_v33 }
 0x20b   : > { %v701_v57 = vadd.f32 %v700_v54, %v599_v49  ;;  %v789_v58 = vpop.f32.mrb[15].mxu1  ;;  %v1562_v59 = vpop.eup %1561  ;;  %1581 = vtanh.f32 %v699_v52  ;;  %v1122_v35 = vand.u32 31, %v1120_v34  ;;  %v1031_v41 = vshrl.u32 %v1688_v40, %v1918_v36 }
 0x20c   : > { %v790_v60 = vadd.f32 %v789_v58, %v599_v49  ;;  %v1564_v61 = vpop.eup %1563  ;;  %1583 = vtanh.f32 %v788_v56  ;;  %v1689_v44 = vmov 683565275   ;;  %v1033_v46 = vshll.u32 %v1688_v40, %v1018_v33 }
 0x20d   : > { %v1566_v62 = vpop.eup %1565  ;;  %1585 = vtanh.f32 %v701_v57  ;;  %v1921_v1 = vsub.s32 32, %v1122_v35  ;;  %v1021_v45 = vshll.u32 %v1689_v44, %v1018_v33  ;;  %v1690_v47 = vmov 1326507024  }
 0x20e   : > { %v1568_v63 = vpop.eup %1567  ;;  %1587 = vtanh.f32 %v790_v60  ;;  %v1440_v0 = vpack.c.bf16 %v1566_v62, %v1558_v51  ;;  %v1034_v48 = vshrl.u32 %v1690_v47, %v1918_v36  ;;  %v1691_v49 = vmov 2475754826  }
 0x20f   : > { %v1570_v2 = vpop.eup %1569  ;;  %v1448_v3 = vpack.c.bf16 %v1568_v63, %v1560_v55  ;;  %v1022_v50 = vshrl.u32 %v1691_v49, %v1918_v36  ;;  %v1024_v51 = vshll.u32 %v1691_v49, %v1018_v33  ;;  %v1692_v52 = vmov 2131351028  }
 0x210   : > { %v1572_v4 = vpop.eup %1571  ;;  %v1438_v5 = vpack.c.bf16 %v1570_v2, %v1562_v59  ;;  %v1025_v53 = vshrl.u32 %v1692_v52, %v1918_v36  ;;  %v1027_v54 = vshll.u32 %v1692_v52, %v1018_v33  ;;  %v1028_v55 = vshrl.u32 %v1687_v38, %v1918_v36 }
 0x211   : > { %v1574_v6 = vpop.eup %1573  ;;  %v1446_v9 = vpack.c.bf16 %v1572_v4, %v1564_v61  ;;  %v1032_v56 = vor.u32 %v1031_v41, %v1030_v39  ;;  %v1134_v57 = vshll.u32 %v1687_v38, %v1122_v35  ;;  %v1135_v58 = vshrl.u32 %v1688_v40, %v1921_v1 }
 0x212   : > { %v1576_v10 = vpop.eup %1575  ;;  %1439 = vmatprep.subr.bf16.mxu0 %v1438_v5  ;;  %v1108_v59 = vand.u32 2147483647, %v1914_v23  ;;  %v1935_v60 = vshrl.u32 %v1120_v34, 5  ;;  %v1137_v61 = vshll.u32 %v1688_v40, %v1122_v35  ;;  %v1138_v62 = vshrl.u32 %v1690_v47, %v1921_v1 }
 0x213   : > { %v1578_v11 = vpop.eup %1577  ;;  %1447 = vmatprep.subr.bf16.mxu1 %v1446_v9  ;;  %1441 = vmatpush1.bf16.msra.mxu0 %v1440_v0  ;;  %v1035_v63 = vor.u32 %v1034_v48, %v1033_v46  ;;  %vm1039_vm5 = vcmp.lt.s32.totalorder %v1926_v43, 4  ;;  %v1125_v0 = vshll.u32 %v1689_v44, %v1122_v35  ;;  %v1126_v2 = vshrl.u32 %v1691_v49, %v1921_v1 }
 0x214   : > { %v1580_v12 = vpop.eup %1579  ;;  %1449 = vmatpush1.bf16.msra.mxu1 %v1448_v3  ;;  %v1128_v3 = vshll.u32 %v1691_v49, %v1122_v35  ;;  %v1129_v4 = vshrl.u32 %v1692_v52, %v1921_v1  ;;  %v1131_v5 = vshll.u32 %v1692_v52, %v1122_v35  ;;  %v1023_v9 = vor.u32 %v1022_v50, %v1021_v45 }
 0x215   : > { %v1582_v13 = vpop.eup %1581  ;;  %vm1143_vm6 = vcmp.lt.s32.totalorder %v1935_v60, 4  ;;  %vm1036_vm7 = vcmp.lt.s32.totalorder %v1926_v43, 1  ;;  %vm1038_vm8 = vcmp.lt.s32.totalorder %v1926_v43, 3  ;;  %vm1037_vm9 = vcmp.lt.s32.totalorder %v1926_v43, 2 }
 0x216   : > { %v1584_v14 = vpop.eup %1583  ;;  %v1444_v15 = vpack.c.bf16 %v1582_v13, %v1574_v6  ;;  %v1132_v6 = vshrl.u32 %v1687_v38, %v1921_v1  ;;  %v1115_v13 = vand.u32 8388607, %v1108_v59  ;;  %vm1140_vm10 = vcmp.lt.s32.totalorder %v1935_v60, 1 }
 0x217   : > { %v1586_v16 = vpop.eup %1585  ;;  %v1452_v17 = vpack.c.bf16 %v1584_v14, %v1576_v10  ;;  %v1026_v10 = vor.u32 %v1025_v53, %v1024_v51  ;;  %v1139_v14 = vor.u32 %v1138_v62, %v1137_v61  ;;  %vm1142_vm11 = vcmp.lt.s32.totalorder %v1935_v60, 3 }
 0x218   : > { %v1588_v18 = vpop.eup %1587  ;;  %v1442_v19 = vpack.c.bf16 %v1586_v16, %v1578_v11  ;;  %v1136_v11 = vor.u32 %v1135_v58, %v1134_v57  ;;  %v1045_v16 = vsel %vm1039_vm5, %v1032_v56, 920167782  ;;  %v1116_v26 = vor.u32 8388608, %v1115_v13 }
 0x219   : > { %v1450_v20 = vpack.c.bf16 %v1588_v18, %v1580_v12  ;;  %v1029_v12 = vor.u32 %v1028_v55, %v1027_v54  ;;  %v1127_v18 = vor.u32 %v1126_v2, %v1125_v0  ;;  %v1044_v24 = vsel %vm1036_vm7, %v1023_v9, %v1026_v10 }
 0x21a   : > { %1443 = vmatprep.subr.bf16.mxu0 %v1442_v19  ;;  %v1130_v19 = vor.u32 %v1129_v4, %v1128_v3  ;;  %v1153_v27 = vsel %vm1143_vm6, %v1139_v14, 1326507024  ;;  %vm1141_vm12 = vcmp.lt.s32.totalorder %v1935_v60, 2  ;;  %v1156_v39 = vshll.u32 %v1116_v26, 8 }
 0x21b   : > { %1451 = vmatprep.subr.bf16.mxu1 %v1450_v20  ;;  %1445 = vmatpush1.bf16.msra.mxu0 %v1444_v15  ;;  %v1012_v15 = vor.u32 8388608, %v1011_v42  ;;  %v1133_v20 = vor.u32 %v1132_v6, %v1131_v5  ;;  %v1046_v25 = vsel %vm1038_vm8, %v1029_v12, %v1045_v16  ;;  %v1048_v28 = vsel %vm1036_vm7, %v1026_v10, %v1029_v12 }
 0x21c   : > { %1453 = vmatpush1.bf16.msra.mxu1 %v1452_v17  ;;  %v1049_v17 = vsel %vm1039_vm5, %v1035_v63, 1326507024  ;;  %v1148_v31 = vsel %vm1140_vm10, %v1127_v18, %v1130_v19  ;;  %v1047_v33 = vsel %vm1037_vm9, %v1044_v24, %v1046_v25  ;;  %v1154_v35 = vsel %vm1142_vm11, %v1136_v11, %v1153_v27 }
 0x21d   : > { %v1050_v29 = vsel %vm1038_vm8, %v1032_v56, %v1049_v17  ;;  %v1052_v30 = vshll.u32 %v1012_v15, 8  ;;  %v1152_v34 = vsel %vm1140_vm10, %v1130_v19, %v1133_v20  ;;  %v1020_v46 = vshrl.u32 %v1689_v44, %v1918_v36 }
 0x21e   : > { %1395 = vmatmul.mubr.msk.f32.vlgmr.msra.gmra.mrb[16].mxu0 %vm601_vm2, %v808_v21  ;;  %v1051_v38 = vsel %vm1037_vm9, %v1048_v28, %v1050_v29  ;;  %v1155_v45 = vsel %vm1141_vm12, %v1152_v34, %v1154_v35  ;;  %v1041_v49 = vsel %vm1039_vm5, %v1029_v12, 2102212464  ;;  %v1124_v52 = vshrl.u32 %v1689_v44, %v1921_v1 }
 0x21f   : > { %1396 = vmatmul.mubr.msk.f32.vlgmr.msra.gmra.mrb[16].mxu1 %vm601_vm2, %v808_v21  ;;  %v1149_v21 = vsel %vm1143_vm6, %v1136_v11, 920167782  ;;  %v1982_v41 = vmul.u32.u64.low %v1052_v30, %v1047_v33  ;;  %v1983_v42 = vmul.u32.u64.high %v1052_v30, %v1047_v33, %v1982_v41  ;;  %v1145_v55 = vsel %vm1143_vm6, %v1133_v20, 2102212464 }
 0x220   : > { %v1150_v32 = vsel %vm1142_vm11, %v1133_v20, %v1149_v21  ;;  %v1989_v47 = vmul.u32.u64.low %v1052_v30, %v1051_v38  ;;  %v1990_v48 = vmul.u32.u64.high %v1052_v30, %v1051_v38, %v1989_v47  ;;  %v1040_v36 = vsel %vm1036_vm7, %v1020_v46, %v1023_v9 }
 0x221   : > { %v1151_v40 = vsel %vm1141_vm12, %v1148_v31, %v1150_v32  ;;  %v1999_v53 = vmul.u32.u64.low %v1156_v39, %v1155_v45  ;;  %v2000_v54 = vmul.u32.u64.high %v1156_v39, %v1155_v45, %v1999_v53  ;;  %v1042_v56 = vsel %vm1038_vm8, %v1026_v10, %v1041_v49 }
 0x222   : > { %v1994_v50 = vmul.u32.u64.low %v1156_v39, %v1151_v40  ;;  %v1995_v51 = vmul.u32.u64.high %v1156_v39, %v1151_v40, %v1994_v50  ;;  %v1144_v57 = vsel %vm1140_vm10, %v1124_v52, %v1127_v18  ;;  %v1146_v58 = vsel %vm1142_vm11, %v1130_v19, %v1145_v55 }
 0x223   : > { %v1043_v1 = vsel %vm1037_vm9, %v1040_v36, %v1042_v56  ;;  %v1062_v44 = vadd.s32 1, %v1983_v42  ;;  %vm1061_vm13 = vc.u32 %v1990_v48, %v1982_v41  ;;  %v1147_v61 = vsel %vm1141_vm12, %v1144_v57, %v1146_v58 }
 0x224   : > { %v1166_v62 = vadd.s32 1, %v1995_v51  ;;  %v1059_v63 = vmul.u32 %v1052_v30, %v1043_v1  ;;  %vm1165_vm14 = vc.u32 %v2000_v54, %v1994_v50  ;;  %v1163_v2 = vmul.u32 %v1156_v39, %v1147_v61 }
 0x225   : > { %v1063_v0 = vsel %vm1061_vm13, %v1062_v44, %v1983_v42  ;;  %v1060_v28 = vadd.s32 %v1982_v41, %v1990_v48  ;;  %v1164_v31 = vadd.s32 %v1994_v50, %v2000_v54  ;;  %vm1110_vm2 = vcmp.lt.s32.totalorder %v1914_v23, 0 }
 0x226   : > { %v1167_v3 = vsel %vm1165_vm14, %v1166_v62, %v1995_v51  ;;  %v1064_v4 = vadd.s32 %v1063_v0, %v1059_v63  ;;  %vm2028_vm3 = vcmp.le.f32.partialorder %v1004_v37, 0.7853982  ;;  %vm2034_vm4 = vcmp.le.f32.partialorder %v1108_v59, 0.7853982 }
 0x227   : > { %v1168_v43 = vadd.s32 %v1167_v3, %v1163_v2  ;;  %vm1096_vm11 = vweird.f32 %v1911_v22  ;;  %vm1200_vm12 = vweird.f32 %v1914_v23 }
 0x228   : > { %v1065_v5 = vadd.s32 536870912, %v1064_v4 }
 0x229   : > { %v1169_v6 = vadd.s32 536870912, %v1168_v43 }
 0x22a   : > { %v1066_v9 = vshrl.u32 %v1065_v5, 30  ;;  %v1222_v5 = vsub.f32 0.0, %v1827_v7 }
 0x22b   : > { %v1170_v10 = vshrl.u32 %v1169_v6, 30  ;;  %v1223_v6 = vsub.f32 0.0, %v1829_v8 }
 0x22c   : > { %v1067_v11 = vshll.u32 %v1066_v9, 30  ;;  %v1090_v44 = vsub.s32 4, %v1066_v9 }
 0x22d   : > { %v1171_v12 = vshll.u32 %v1170_v10, 30  ;;  %v1194_v61 = vsub.s32 4, %v1170_v10 }
 0x22e   : > { %v1068_v60 = vsub.s32 %v1064_v4, %v1067_v11  ;;  %v1091_v62 = vsel %vm1006_vm1, %v1090_v44, %v1066_v9 }
 0x22f   : > { %v1172_v13 = vsub.s32 %v1168_v43, %v1171_v12  ;;  %v1195_v63 = vsel %vm1110_vm2, %v1194_v61, %v1170_v10  ;;  %v1093_v59 = vsel %vm2028_vm3, 0, %v1091_v62 }
 0x230   : > { %v1070_v14 = vsub.s32 0, %v1068_v60  ;;  %v1197_v0 = vsel %vm2034_vm4, 0, %v1195_v63  ;;  %v1097_v2 = vadd.s32 3, %v1093_v59 }
 0x231   : > { %v1174_v15 = vsub.s32 0, %v1172_v13  ;;  %v1201_v3 = vadd.s32 3, %v1197_v0 }
 0x232   : > { %v1405_v16 = vmin.u32 %v1070_v14, %v1068_v60  ;;  %v1098_v10 = vand.u32 3, %v1097_v2  ;;  %v1224_v14 = vmul.f32 1.442695, %v1222_v5 }
 0x233   : > { %v1409_v17 = vmin.u32 %v1174_v15, %v1172_v13  ;;  %v1202_v12 = vand.u32 3, %v1201_v3  ;;  %v1226_v15 = vmul.f32 1.442695, %v1223_v6 }
 0x234   : > { %v1072_v18 = vclz %v1405_v16  ;;  %vm1100_vm5 = vcmp.eq.s32.totalorder %v1098_v10, 0  ;;  %vm1103_vm6 = vcmp.eq.s32.totalorder %v1098_v10, 2  ;;  %vm1099_vm9 = vcmp.lt.s32.totalorder %v1098_v10, 2 }
 0x235   : > { %v1176_v19 = vclz %v1409_v17  ;;  %vm1204_vm7 = vcmp.eq.s32.totalorder %v1202_v12, 0  ;;  %vm1207_vm8 = vcmp.eq.s32.totalorder %v1202_v12, 2  ;;  %vm1203_vm10 = vcmp.lt.s32.totalorder %v1202_v12, 2 }
 0x236   : > { %v1406_v20 = vadd.s32 4294967294, %v1072_v18  ;;  %v815_v18 = vlaneseq }
 0x237   : > { %v1410_v21 = vadd.s32 4294967294, %v1176_v19  ;;  %v968_v19 = vstv %s2048_s21  ;;  %s1620_s21 = sshll.u32 %s1694_s7, 4  ;;  %s1621_s21 = int_to_ptr.vmem [resolvable:$false] %s1620_s21 }
 0x238   : > { %vm1407_vm15 = vcmp.lt.s32.totalorder %v1406_v20, 0  ;;  %vm1277_vm13 = vcmp.lt.s32.totalorder %v815_v18, 512  ;;  %p1623_p13 = scmp.lt.s32.totalorder %s2081_s11, %s1621_s21 }
 0x239   : > { %vm1411_vm0 = vcmp.lt.s32.totalorder %v1410_v21, 0  ;;  %v1075_v24 = vsel %vm1407_vm15, 0, %v1406_v20  ;;  %v971_v20 = vstv %s2050_s22  ;;  %s1622_s22 = scalar_lea.vmem %s1621_s21, 128 }
 0x23a   : > { %v1179_v25 = vsel %vm1411_vm0, 0, %v1410_v21  ;;  %v1080_v26 = vsub.s32 4294967266, %v1075_v24  ;;  %v1076_v29 = vsub.s32 32, %v1075_v24  ;;  %v1077_v34 = vshll.u32 %v1068_v60, %v1075_v24  ;;  %p1624_p0 = scmp.lt.s32.totalorder %s1622_s22, %s1616_s20 }
 0x23b   : > { %v1184_v27 = vsub.s32 4294967266, %v1179_v25  ;;  %v1180_v32 = vsub.s32 32, %v1179_v25  ;;  %v1181_v39 = vshll.u32 %v1172_v13, %v1179_v25  ;;  %v976_v21 = vstv %s2052_s23 }
 0x23c   : > { %v1081_v30 = vadd.s32 127, %v1080_v26  ;;  %v1078_v35 = vshrl.u32 %v1060_v28, %v1076_v29  ;;  %v816_v28 = vshrl.u32 %v815_v18, 7  ;;  %v969_v29 = vsub.f32 %v1827_v7, %v968_v19  ;;  %p1625_p1 = por %p1624_p0, %p1623_p13 }
 0x23d   : > { %v1185_v33 = vadd.s32 127, %v1184_v27  ;;  %v1182_v40 = vshrl.u32 %v1164_v31, %v1180_v32  ;;  %v977_v31 = vsub.f32 %v1827_v7, %v976_v21  ;;  %v989_v32 = vstv %s2056_s25 }
 0x23e   : > { %v1082_v38 = vshll.u32 %v1081_v30, 23  ;;  %v1079_v45 = vor.u32 %v1078_v35, %v1077_v34  ;;  %v972_v30 = vsub.f32 %v1827_v7, %v971_v20  ;;  %v970_v34 = vsub.f32 %v1829_v8, %v968_v19  ;;  %p1626_p2 = pnand %p1625_p1, %p1619_p12 }
 0x23f   : > { %v1186_v42 = vshll.u32 %v1185_v33, 23  ;;  %v1183_v47 = vor.u32 %v1182_v40, %v1181_v39  ;;  %v973_v35 = vsub.f32 %v1829_v8, %v971_v20 }
 0x240   : > { %v1083_v46 = vor.u32 4788187, %v1082_v38  ;;  %v1086_v52 = vcvt.s32.f32 %v1079_v45  ;;  %v978_v38 = vsub.f32 %v1829_v8, %v976_v21  ;;  %v1400_v45 = vrot.slane %v977_v31, 9 }
 0x241   : > { %v1187_v49 = vor.u32 4788187, %v1186_v42  ;;  %v1190_v41 = vcvt.s32.f32 %v1183_v47  ;;  %v974_v42 = vmul.f32 %v972_v30, %v969_v29 }
 0x242   : > { %v1084_v51 = vand.u32 2147483647, %v1083_v46  ;;  %v990_v46 = vsub.f32 %v1827_v7, %v989_v32 }
 0x243   : > { %v1188_v53 = vand.u32 2147483647, %v1187_v49  ;;  %v817_v49 = vsub.s32 0, %v816_v28 }
 0x244   : > { %v1087_v48 = vmul.f32 %v1086_v52, %v1084_v51  ;;  %v975_v51 = vmul.f32 %v973_v35, %v970_v34  ;;  %v1401_v52 = vrot.slane %v978_v38, 9 }
 0x245   : > { %v1191_v55 = vmul.f32 %v1190_v41, %v1188_v53  ;;  %v813_v53 = vpop.permute.xlu0 %812 }
 0x246   : > { %v1088_v36 = vxor.u32 2147483648, %v1087_v48  ;;  %v818_v57 = vrot.slane %v813_v53, %v817_v49 }
 0x247   : > { %v1192_v50 = vxor.u32 2147483648, %v1191_v55 }
 0x248   : > { %v1089_v56 = vsel %vm1006_vm1, %v1088_v36, %v1087_v48 }
 0x249   : > { %v1193_v58 = vsel %vm1110_vm2, %v1192_v50, %v1191_v55  ;;  %v1092_v1 = vsel %vm2028_vm3, %v1911_v22, %v1089_v56  ;;  %v991_v22 = vsub.f32 %v1829_v8, %v989_v32  ;;  %v1693_v50 = vmov 1966171168  }
 0x24a   : > { %v1196_v37 = vsel %vm2034_vm4, %v1914_v23, %v1193_v58  ;;  %1589 = vcosq.f32 %v1092_v1  ;;  %v1253_v54 = vunpack.c.l.s4 %v1693_v50  ;;  %v987_v23 = vmul.f32 %v1400_v45, %v974_v42 }
 0x24b   : > { %1591 = vsinq.f32 %v1092_v1  ;;  %v1402_v56 = vrot.slane %v990_v46, 9  ;;  %v988_v58 = vmul.f32 %v1401_v52, %v975_v51  ;;  %v1403_v1 = vrot.slane %v991_v22, 9 }
 0x24c   : > { %1593 = vcosq.f32 %v1196_v37  ;;  %v1254_v0 = vunpack.c.0.s8 %v1253_v54 }
 0x24d   : > { %1595 = vsinq.f32 %v1196_v37  ;;  %v1001_v6 = vmul.f32 %v1403_v1, %v988_v58 }
 0x24e   : > { %1597 = vpow2.f32 %v1224_v14 }
 0x24f   : > { %1599 = vpow2.f32 %v1226_v15 }
 0x254   : > { %v1590_v4 = vpop.eup %1589 }
 0x255   : > { %v1592_v43 = vpop.eup %1591  ;;  %v1104_v13 = vxor.u32 2147483648, %v1590_v4 }
 0x256   : > { %v1594_v9 = vpop.eup %1593  ;;  %v1101_v60 = vxor.u32 2147483648, %v1592_v43 }
 0x257   : > { %v1596_v11 = vpop.eup %1595  ;;  %v1208_v17 = vxor.u32 2147483648, %v1594_v9  ;;  %v1105_v25 = vsel %vm1103_vm6, %v1104_v13, %v1592_v43 }
 0x258   : > { %v1205_v16 = vxor.u32 2147483648, %v1596_v11  ;;  %v1102_v24 = vsel %vm1100_vm5, %v1590_v4, %v1101_v60  ;;  %v1598_v48 = vpop.eup %1597  ;;  %v1000_v4 = vmul.f32 %v1402_v56, %v987_v23  ;;  %v1257_v60 = vsub.s32 %v1254_v0, %v816_v28 }
 0x259   : > { %v1209_v27 = vsel %vm1207_vm8, %v1208_v17, %v1596_v11  ;;  %v1106_v33 = vsel %vm1099_vm9, %v1102_v24, %v1105_v25  ;;  %v1600_v36 = vpop.eup %1599  ;;  %v1414_v61 = vrot.slane %v1598_v48, 10 }
 0x25a   : > { %v1206_v26 = vsel %vm1204_vm7, %v1594_v9, %v1205_v16  ;;  %v1107_v40 = vsel %vm1096_vm11, nan, %v1106_v33  ;;  %v1415_v59 = vrot.slane %v1600_v36, 10 }
 0x25b   : > { %v1210_v39 = vsel %vm1203_vm10, %v1206_v26, %v1209_v27  ;;  %v1412_v41 = vrot.slane %v1107_v40, 9 }
 0x25c   : > { %v1211_v47 = vsel %vm1200_vm12, nan, %v1210_v39 }
 0x25d   : > { %v1413_v55 = vrot.slane %v1211_v47, 9  ;;  %v1220_v44 = vmul.f32 %v1412_v41, %v1107_v40 }
 0x25f   : > { %v1221_v8 = vmul.f32 %v1413_v55, %v1211_v47  ;;  %v1236_v9 = vmul.f32 %v1414_v61, %v1220_v44 }
 0x261   : > { %v1237_v11 = vmul.f32 %v1415_v59, %v1221_v8 }
 0x2f1   : > { %v888_v7 = vpop.f32.mrb[16].mxu0 }
 0x2f2   : > { %v889_v37 = vadd.f32 %v888_v7, %v818_v57  ;;  %v959_v62 = vpop.f32.mrb[16].mxu1  ;;  %v890_v63 = vpop.f32.mrb[17].mxu0 }
 0x2f3   : > { %v960_v2 = vadd.f32 %v959_v62, %v818_v57  ;;  %v891_v3 = vadd.f32 %v890_v63, %v818_v57  ;;  %v961_v43 = vpop.f32.mrb[17].mxu1 }
 0x2f4   : > { %v962_v5 = vadd.f32 %v961_v43, %v818_v57 }
 0x2f5   : > { %v1242_v10 = vcombine.low %v889_v37, %v891_v3 }
 0x2f6   : > { %v1243_v12 = vcombine.low %v960_v2, %v962_v5 }
 0x2f7   : > { %v1246_v13 = vmul.f32 %v1242_v10, %v1000_v4 }
 0x2f8   : > { %v1247_v14 = vmul.f32 %v1243_v12, %v1001_v6 }
 0x2f9   : > { %v1248_v15 = vadd.f32 %v1246_v13, %v1236_v9 }
 0x2fa   : > { %v1249_v16 = vadd.f32 %v1247_v14, %v1237_v11 }
 0x2fb   : > { %v1258_v17 = vrot.slane %v1248_v15, %v1257_v60 }
 0x2fc   : > { %v1265_v19 = vrot.slane %v1249_v16, %v1257_v60 }
 0x2fe   : > { %v1266_v20 = vcombine.low %v1258_v17, %v1265_v19 }
 0x300   : > { %v1273_v21 = vrot.slane %v1266_v20, %v1257_v60 }
 0x302   : > { %1279 = vst.msk [vmem:[%s315_s28] sm:$0xf] %vm1277_vm13, %v1273_v21 }
 0x303   : > { %1629 = shalt.err (!%p1626_p2)
}
 0x304   : > { %s1630_s23 = scalar_lea.hbm %s2079_s18, 64  ;;  %s1634_s26 = scalar_lea.hbm %s2129_s8, 128 }
 0x305   : > { %p1631_p3 = scmp.ne.s32.totalorder %s2079_s18, %s1630_s23  ;;  %p1635_p8 = scmp.lt.u32.totalorder %s2079_s18, %s2129_s8 }
 0x306   : > { %p1636_p11 = scmp.lt.u32.totalorder %s1634_s26, %s1630_s23  ;;  %p1638_p10 = scmp.lt.u32.totalorder %s1630_s23, %s2079_s18 }
 0x307   : > { %p1632_p4 = pnand %p1631_p3, %p1781_p5 }
 0x308   : > { %p1637_p9 = por %p1636_p11, %p1635_p8 }
 0x309   : > { %p1633_p7 = pneg %p1632_p4 }
 0x30a   : > { %p1639_p12 = por %p1638_p10, %p1637_p9 }
 0x30c   : > { %p1640_p13 = pnand %p1639_p12, %p1633_p7 }
 0x30e   : > { %1643 = shalt.err (!%p1640_p13)
}
 0x30f   : > { %1466 = dma.vmem_to_hbm [thread:$0]  (%p1781_p5), %s2081_s11, 64, %s2079_s18, %s1281_s19  }
 0x310 PF: > { %p1478_p0 = scmp.ge.s32.totalorder %s1682_s10, 2  ;;  %s1307_s13 = sand.u32 1, %s1670_s29  }
 0x311   : > { %s1308_s14 = scalar_lea.sflag [#allocation4], %s1307_s13 }
 0x312   : > { %p1473_p1 = pnand %p1478_p0, %p1785_p6 }
 0x314   : > { %1665 = dma.done.wait (!%p1473_p1), %s1308_s14, 64  }
 0x315   : > { %1667 = vsyncadd (!%p1473_p1), %s1308_s14, 4294967232  ;;  %p21_p2 = scmp.ge.s32.totalorder %s1768_s12, 4   ;;  %s2137_s29 = smov %s1674_s30 }
 0x316   : > { %s2138_s30 = smov %s1678_s9  ;;  %s2139_s9 = smov %s1779_s15 }
 0x317   : > { %s2140_s10 = smov %s1768_s12  ;;  %23 = sbr.rel (!%p21_p2) target bundleno = 7 (0x7), region = 92 }
 0x31e   :  { %1313 = vsyncpa [#allocation4], 1 }
 0x31f   :  { %1315 = vsyncpa [#allocation4 + $0x1], 1 }
 0x320   :  { %1316 = vsyncpa [#allocation5], 1 }
 0x321   :  { %1318 = vsyncpa [#allocation5 + $0x1], 1 }

</bundles_post_ra>
